<compile_context>
chip_gen: v7x
topology: tpu7x:2x2x1
jax: 0.10.0
libtpu: 0.0.40
codegen_flags: <defaults>
</compile_context>

<pallas_src>
import functools

import jax
import jax.numpy as jnp
from jax.experimental import pallas as pl
from jax.experimental.pallas import tpu as pltpu


def _round_up(x, m):
    return (x + m - 1) // m * m


def _cdiv(a, b):
    return (a + b - 1) // b


def _vmem_capacity_bytes():
    """Physical VMEM; conservative 64 MiB (v7x per-TC) fallback."""
    try:
        cap = int(pltpu.get_tpu_info().vmem_capacity_bytes)
        if cap > 0:
            return cap
    except Exception:
        pass
    return 64 << 20


# ---------------------------------------------------------------------------
# Main path: W + bias fully resident in VMEM, 1-D grid over the batch only.
# ---------------------------------------------------------------------------
def _logreg_kernel_resident(x_ref, w_ref, b_ref, o_ref):
    o_ref[...] = (
        jnp.dot(x_ref[...], w_ref[...], preferred_element_type=jnp.float32)
        + b_ref[...]
    ).astype(o_ref.dtype)


# ---------------------------------------------------------------------------
# Fallback path (W does not fit in VMEM): K-tiled reduction, accumulating
# directly into the f32 output block (no scratch); bias added on last K step.
# ---------------------------------------------------------------------------
def _logreg_kernel_ktiled(x_ref, w_ref, b_ref, o_ref):
    k = pl.program_id(1)

    @pl.when(k == 0)
    def _():
        o_ref[...] = jnp.zeros_like(o_ref)

    o_ref[...] += jnp.dot(
        x_ref[...], w_ref[...], preferred_element_type=jnp.float32
    )

    @pl.when(k == pl.num_programs(1) - 1)
    def _():
        o_ref[...] += b_ref[...]


@functools.partial(jax.jit, static_argnames=("force_ktiled",))
def logreg_forward(x, w, b, *, force_ktiled=False):
    """x: (B, F) f32, w: (F, C) f32, b: (1, C) or (C,) f32 -> (B, C) f32."""
    B, F = x.shape
    Fw, C = w.shape
    assert Fw == F, "weight must be (ft_in, nb_classes)"
    b = b.reshape(1, C)

    # Per-TensorCore VMEM budget: never exceed v7x's 64 MiB/TC, keep headroom.
    cap = _vmem_capacity_bytes()
    budget = max(24 << 20, min(cap, 64 << 20) - (8 << 20))

    # W resident whenever it fits comfortably (covers virtually any LogReg).
    resident = (not force_ktiled) and (4 * F * C <= (12 << 20))

    if resident:
        # >= 2 "parallel" grid steps when possible (v7x has 2 TCs/chip),
        # otherwise as large a batch tile as VMEM allows.
        tm = min(2048, max(8, _round_up(_cdiv(B, 2), 8)))

        def _need(t):  # double-buffered x/out tiles + (counted 2x) W + bias
            return 4 * (2 * t * F + 2 * t * C + 2 * F * C + 2 * C)

        while tm > 8 and _need(tm) > budget:
            tm = max(8, _round_up(tm // 2, 8))

        grid = (_cdiv(B, tm),)
        vmem_limit = int(min(max(_need(tm) + (4 << 20), 32 << 20), budget))

        return pl.pallas_call(
            _logreg_kernel_resident,
            out_shape=jax.ShapeDtypeStruct((B, C), x.dtype),
            grid_spec=pltpu.PrefetchScalarGridSpec(
                num_scalar_prefetch=0,
                grid=grid,
                in_specs=[
                    pl.BlockSpec((tm, F), lambda i: (i, 0)),   # x batch tile
                    pl.BlockSpec((F, C), lambda i: (0, 0)),    # W, VMEM-resident
                    pl.BlockSpec((1, C), lambda i: (0, 0)),    # bias, resident
                ],
                out_specs=pl.BlockSpec((tm, C), lambda i: (i, 0)),
            ),
            compiler_params=pltpu.CompilerParams(
                dimension_semantics=("parallel",),
                vmem_limit_bytes=vmem_limit,
            ),
            cost_estimate=pl.CostEstimate(
                flops=2 * B * F * C,
                transcendentals=0,
                bytes_accessed=4 * (B * F + F * C + B * C + C),
            ),
        )(x, w, b)

    # ---------------- fallback: K-tiled reduction (huge W only) --------------
    tk = min(512, _round_up(F, 128))
    tm = min(1024, max(8, _round_up(_cdiv(B, 2), 8)))

    def _need(t, k):
        return 4 * (2 * t * k + 2 * k * C + 2 * t * C + 2 * C)

    while tm > 8 and _need(tm, tk) > budget:
        tm = max(8, _round_up(tm // 2, 8))
    while tk > 128 and _need(tm, tk) > budget:
        tk = max(128, _round_up(tk // 2, 128))

    f_pad = _round_up(F, tk)
    # Zero-padding the reduction axis only (contributes nothing to the matmul).
    xp = jnp.pad(x, ((0, 0), (0, f_pad - F)))
    wp = jnp.pad(w, ((0, f_pad - F), (0, 0)))

    grid = (_cdiv(B, tm), f_pad // tk)
    vmem_limit = int(min(max(_need(tm, tk) + (4 << 20), 32 << 20), budget))

    return pl.pallas_call(
        _logreg_kernel_ktiled,
        out_shape=jax.ShapeDtypeStruct((B, C), x.dtype),
        grid_spec=pltpu.PrefetchScalarGridSpec(
            num_scalar_prefetch=0,
            grid=grid,
            in_specs=[
                pl.BlockSpec((tm, tk), lambda i, k: (i, k)),   # x tile
                pl.BlockSpec((tk, C), lambda i, k: (k, 0)),    # W K-slab
                pl.BlockSpec((1, C), lambda i, k: (0, 0)),     # bias, resident
            ],
            out_specs=pl.BlockSpec((tm, C), lambda i, k: (i, 0)),
        ),
        compiler_params=pltpu.CompilerParams(
            dimension_semantics=("parallel", "arbitrary"),
            vmem_limit_bytes=vmem_limit,
        ),
        cost_estimate=pl.CostEstimate(
            flops=2 * B * F * C,
            transcendentals=0,
            bytes_accessed=4 * (B * f_pad + grid[0] * f_pad * C + B * C + C),
        ),
    )(xp, wp, b)


def init_logreg_params(key, ft_in, nb_classes):
    """Mirror torch: xavier_uniform_ on weight, bias = 0.
    torch weight is (nb_classes, ft_in); the xavier bound is symmetric in
    fan_in/fan_out, so sampling directly in the transposed (ft_in, nb_classes)
    layout is equivalent."""
    bound = float(jnp.sqrt(6.0 / (ft_in + nb_classes)))
    w = jax.random.uniform(
        key, (ft_in, nb_classes), jnp.float32, minval=-bound, maxval=bound
    )
    b = jnp.zeros((1, nb_classes), jnp.float32)
    return w, b


if __name__ == "__main__":
    key = jax.random.PRNGKey(0)
    k_x, k_w, k_x2, k_w2, k_x3, k_w3 = jax.random.split(key, 6)

    # Case 1: the module's toy shape (8 x 32 -> 16). Resident path, grid=(1,).
    B, F, C = 8, 32, 16
    x = jax.random.normal(k_x, (B, F), jnp.float32)
    w, b = init_logreg_params(k_w, F, C)
    out = logreg_forward(x, w, b)
    jax.block_until_ready(out)
    ref = x @ w + b
    assert out.shape == (B, C)
    assert jnp.allclose(out, ref, atol=1e-5, rtol=1e-5)

    # Case 2: non-aligned shapes — batch tail masking + unaligned F/C, no pads.
    B2, F2, C2 = 260, 300, 10
    x2 = jax.random.normal(k_x2, (B2, F2), jnp.float32)
    w2, b2 = init_logreg_params(k_w2, F2, C2)
    out2 = logreg_forward(x2, w2, b2)
    jax.block_until_ready(out2)
    ref2 = x2 @ w2 + b2
    assert out2.shape == (B2, C2)
    assert jnp.allclose(out2, ref2, atol=1e-4, rtol=1e-4)

    # Case 3: exercise the K-tiled fallback path explicitly.
    B3, F3, C3 = 64, 256, 32
    x3 = jax.random.normal(k_x3, (B3, F3), jnp.float32)
    w3, b3 = init_logreg_params(k_w3, F3, C3)
    out3 = logreg_forward(x3, w3, b3, force_ktiled=True)
    jax.block_until_ready(out3)
    ref3 = x3 @ w3 + b3
    assert out3.shape == (B3, C3)
    assert jnp.allclose(out3, ref3, atol=1e-4, rtol=1e-4)

    print("KERNEL_OK")
</pallas_src>

<mosaic_0001>
module attributes {stable_mosaic.version = 11 : i64} {
  func.func @_logreg_kernel_resident(%arg0: i32, %arg1: memref<8x32xf32, #tpu.memory_space<vmem>>, %arg2: memref<32x16xf32, #tpu.memory_space<vmem>>, %arg3: memref<1x16xf32, #tpu.memory_space<vmem>>, %arg4: memref<8x16xf32, #tpu.memory_space<vmem>>) attributes {dimension_semantics = [#tpu.dimension_semantics<parallel>], iteration_bounds = array<i64: 1>, scalar_prefetch = 0 : i64, scratch_operands = 0 : i64, tpu.core_type = #tpu.core_type<tc>, window_params = [{transform_indices = @transform_0, window_bounds = array<i64: 8, 32>}, {pipeline_mode = #tpu.pipeline_mode<synchronous>, transform_indices = @transform_1, window_bounds = array<i64: 32, 16>}, {pipeline_mode = #tpu.pipeline_mode<synchronous>, transform_indices = @transform_2, window_bounds = array<i64: 1, 16>}, {transform_indices = @transform_3, window_bounds = array<i64: 8, 16>}]} {
    %c0 = arith.constant 0 : index
    %c0_0 = arith.constant 0 : index
    %0 = vector.load %arg1[%c0, %c0_0] : memref<8x32xf32, #tpu.memory_space<vmem>>, vector<8x32xf32>
    %c0_1 = arith.constant 0 : index
    %c0_2 = arith.constant 0 : index
    %1 = vector.load %arg2[%c0_1, %c0_2] : memref<32x16xf32, #tpu.memory_space<vmem>>, vector<32x16xf32>
    %cst = arith.constant dense<0.000000e+00> : vector<8x16xf32>
    %2 = tpu.matmul %0, %1, %cst {dimension_numbers = #tpu.dot_dimension_numbers<[1], [0], [0], [1], [0, 0, 1, 1], [], []>} : vector<8x32xf32>, vector<32x16xf32>, vector<8x16xf32> -> vector<8x16xf32>
    %c0_3 = arith.constant 0 : index
    %c0_4 = arith.constant 0 : index
    %3 = vector.load %arg3[%c0_3, %c0_4] : memref<1x16xf32, #tpu.memory_space<vmem>>, vector<1x16xf32>
    %4 = vector.broadcast %3 : vector<1x16xf32> to vector<8x16xf32>
    %5 = arith.addf %2, %4 : vector<8x16xf32>
    %c0_5 = arith.constant 0 : index
    %c0_6 = arith.constant 0 : index
    %6 = vector.load %arg4[%c0_5, %c0_6] : memref<8x16xf32, #tpu.memory_space<vmem>>, vector<8x16xf32>
    tpu.vector_store %arg4[%c0_5, %c0_6], %5 {strides = array<i32>} : memref<8x16xf32, #tpu.memory_space<vmem>>, vector<8x16xf32>,
    return
  }
  func.func @transform_0(%arg0: i32) -> (i32, i32) {
    %c0_i32 = arith.constant 0 : i32
    %c0_i32_0 = arith.constant 0 : i32
    return %arg0, %c0_i32 : i32, i32
  }
  func.func @transform_1(%arg0: i32) -> (i32, i32) {
    %c0_i32 = arith.constant 0 : i32
    %c0_i32_0 = arith.constant 0 : i32
    %c0_i32_1 = arith.constant 0 : i32
    return %c0_i32, %c0_i32_0 : i32, i32
  }
  func.func @transform_2(%arg0: i32) -> (i32, i32) {
    %c0_i32 = arith.constant 0 : i32
    %c0_i32_0 = arith.constant 0 : i32
    %c0_i32_1 = arith.constant 0 : i32
    return %c0_i32, %c0_i32_0 : i32, i32
  }
  func.func @transform_3(%arg0: i32) -> (i32, i32) {
    %c0_i32 = arith.constant 0 : i32
    %c0_i32_0 = arith.constant 0 : i32
    return %arg0, %c0_i32 : i32, i32
  }
}

</mosaic_0001>

<bundles_post_ra>
// kernel: logreg_forward.1
= control target key start
LH: loop header
LB: loop body
LE: loop exit
PB: predicated region body
PF: predicated region fallthrough
CT: control target
= control target key end

     0   :  { %v169_v3 = vmov 0.0|0.0   ;;  %vm170_vm0 = vmmov 0   ;;  %v171_v6 = vmov 0.0   ;;  %s223_s0 = inlined_call_operand.vmem [shape: f32[8,32], index: 0, kind: input, shape index: {}]   ;;  %s224_s1 = inlined_call_operand.vmem [shape: f32[32,16], index: 1, kind: input, shape index: {}]   ;;  %s225_s2 = inlined_call_operand.vmem [shape: f32[1,16], index: 2, kind: input, shape index: {}]   ;;  %s226_s3 = inlined_call_operand.hbm [shape: f32[8,16], index: 3, kind: output, shape index: {}]  }
   0x1   :  { %v16_v0 = vld [vmem:[%s224_s1] sm:$0xff]  ;;  %v17_v1 = vld [vmem:[%s224_s1 + $0x8] sm:$0xff]  ;;  %v18_v2 = vld [vmem:[%s224_s1 + $0x10] sm:$0xff]  ;;  %135 = vmatprep.subr.bf16.mxu0 %v169_v3  ;;  %132 = vmatprep.mubr.msk.f32.mxu0 %vm170_vm0, %v171_v6 }
   0x2   :  { %v136_v4 = vpack.c.bf16 %v17_v1, %v16_v0  ;;  %v19_v5 = vld [vmem:[%s224_s1 + $0x18] sm:$0xff] }
   0x3   :  { %8 = vsyncpa [#allocation3], 0  ;;  %v139_v7 = vpack.c.bf16 %v19_v5, %v18_v2  ;;  %v15_v8 = vld [vmem:[%s223_s0] sm:$0xff]  ;;  %vm27_vm1 = vcmask 261120   ;;  %s172_s24 = smov [#allocation2]   ;;  %vm101_vm2 = vcmask 130048  }
   0x4   :  { %137 = vmatpush3.bf16.msra.mxu0 %v136_v4  ;;  %v117_v9 = vld [vmem:[%s225_s2] ss:$0 sm:$0xff]  ;;  %s109_s1 = sshll.u32 %s172_s24, 4  ;;  %s110_s1 = int_to_ptr.vmem [resolvable:$true] %s109_s1 }
   0x5   :  { %138 = vmatprep.subr.bf16.mxu0 %v169_v3  ;;  %s145_s25 = scalar_lea.vmem %s110_s1, 128  ;;  %p150_p1 = scmp.lt.s32.totalorder %s110_s1, %s110_s1 }
   0x6   :  { %p146_p0 = scmp.ne.s32.totalorder %s110_s1, %s145_s25  ;;  %p151_p2 = scmp.lt.s32.totalorder %s145_s25, %s145_s25 }
   0x8   :  { %140 = vmatpush3.bf16.msra.mxu0 %v139_v7  ;;  %p152_p3 = por %p151_p2, %p150_p1 }
   0xa   :  { %p153_p4 = pnand %p152_p3, %p146_p0 }
   0xb   :  { %133 = vmatmul.mubr.msk.f32.vlgmr.msra.gmra.mrb[0].mxu0 %vm27_vm1, %v15_v8 }
  0xde   :  { %v97_v10 = vpop.f32.mrb[0].mxu0 }
  0xdf   :  { %v98_v11 = vadd.f32 %v117_v9, %v97_v10  ;;  %v134_v12 = vpop.f32.mrb[1].mxu0 }
  0xe1   :  { %102 = vst.msk [vmem:[#allocation2] sm:$0xff] %vm101_vm2, %v98_v11 }
  0xe2   :  { %156 = shalt.err (!%p153_p4)
}
  0xe3   :  { %s157_s27 = scalar_lea.hbm %s226_s3, 128 }
  0xe4   :  { %p158_p5 = scmp.ne.s32.totalorder %s226_s3, %s157_s27  ;;  %p161_p6 = scmp.lt.u32.totalorder %s157_s27, %s226_s3 }
  0xe6   :  { %p163_p7 = pnand %p161_p6, %p158_p5 }
  0xe8   :  { %166 = shalt.err (!%p163_p7)
}
  0xe9   :  { %112 = dma.vmem_to_hbm [thread:$0]  %s110_s1, 128, %s226_s3, [#allocation3]  }
  0xea   :  { %167 = dma.done.wait [#allocation3], 128  }
  0xeb   :  { %168 = vsyncadd [#allocation3], 4294967168 }
  0xec   :  { %116 = vsyncpa [#allocation3], 1 }

</bundles_post_ra>
